<compile_context>
chip_gen: v5e
topology: v5e:2x2
jax: 0.10.0
libtpu: 0.0.40
codegen_flags: <defaults>
</compile_context>

<pallas_src>
import functools
import math

import jax
import jax.numpy as jnp
from jax.experimental import pallas as pl
from jax.experimental.pallas import tpu as pltpu

# 48 MiB: a raise over the 32 MiB scoped default that is still safe on v7x
# (64 MiB physical VMEM); v5e/v6e (128 MiB) could go to 64-96 MiB.
_VMEM_LIMIT = 48 * 1024 * 1024


def _pick_tile(dim, target, align):
    """Largest `align`-multiple divisor of dim that is <= target, falling back
    to the full dim (a full-extent block is always legal for BlockSpec)."""
    if dim <= target:
        return dim
    t = (target // align) * align
    while t >= align:
        if dim % t == 0:
            return t
        t -= align
    return dim


# ----------------------------------------------------------------------------
# Kernel 1: tiled dense layer  y[g] = x @ W[g] + b[g]
#   grid = (G, M blocks, N blocks, K blocks); f32 VMEM accumulator; the K axis
#   is the innermost ("arbitrary") reduction axis.
# ----------------------------------------------------------------------------
def _linear_kernel(x_ref, w_ref, b_ref, o_ref, acc_ref):
    k = pl.program_id(3)

    @pl.when(k == 0)
    def _():
        acc_ref[...] = jnp.zeros_like(acc_ref)

    # Inputs are already bf16 (cast once in the wrapper), accumulate in f32.
    acc_ref[...] += jnp.dot(x_ref[...], w_ref[...],
                            preferred_element_type=jnp.float32)

    @pl.when(k == pl.num_programs(3) - 1)
    def _():
        o_ref[...] = (acc_ref[...] + b_ref[...]).astype(o_ref.dtype)


def pallas_linear(x, w, b, out_dtype=jnp.bfloat16, tm=512, tn=256, tk=1024):
    """x: (M, K) bf16, w: (G, K, N) bf16, b: (G, 1, N) f32 -> (G, M, N).

    G > 1 is used for the fused QKV projection (stacked weights): each of the
    G outputs is written directly, so no post-hoc slicing pass over HBM.
    """
    M, K = x.shape
    G, Kw, N = w.shape
    assert K == Kw and b.shape == (G, 1, N)
    tm = _pick_tile(M, tm, 8)
    tn = _pick_tile(N, tn, 128)
    tk = _pick_tile(K, tk, 128)
    grid = (G, M // tm, N // tn, K // tk)

    cost = pl.CostEstimate(
        flops=2 * G * M * N * K,
        transcendentals=0,
        bytes_accessed=(G * M * K * x.dtype.itemsize
                        + G * K * N * w.dtype.itemsize
                        + G * N * b.dtype.itemsize
                        + G * M * N * jnp.dtype(out_dtype).itemsize))

    return pl.pallas_call(
        _linear_kernel,
        out_shape=jax.ShapeDtypeStruct((G, M, N), out_dtype),
        grid_spec=pltpu.PrefetchScalarGridSpec(
            num_scalar_prefetch=0,
            grid=grid,
            in_specs=[
                pl.BlockSpec((tm, tk), lambda g, i, j, k: (i, k)),
                pl.BlockSpec((None, tk, tn), lambda g, i, j, k: (g, k, j)),
                pl.BlockSpec((None, 1, tn), lambda g, i, j, k: (g, 0, j)),
            ],
            out_specs=pl.BlockSpec((None, tm, tn),
                                   lambda g, i, j, k: (g, i, j)),
            scratch_shapes=[pltpu.VMEM((tm, tn), jnp.float32)]),
        compiler_params=pltpu.CompilerParams(
            dimension_semantics=("parallel", "parallel", "parallel",
                                 "arbitrary"),
            vmem_limit_bytes=_VMEM_LIMIT),
        cost_estimate=cost,
    )(x, w, b)


# ----------------------------------------------------------------------------
# Kernel 2: flash-style scaled dot-product attention, all heads per grid step
#   grid = (B, Q blocks, KV blocks); online softmax over the KV axis.
#   q/k/v tiles are lane-dense (t, d_model) slabs; heads are static in-register
#   lane slices of width d_k.  Q is pre-scaled (scale folded into W_q).
# ----------------------------------------------------------------------------
def _mha_flash_kernel(q_ref, k_ref, v_ref, o_ref, m_ref, l_ref, acc_ref, *,
                      n_heads, d_k):
    kv = pl.program_id(2)

    @pl.when(kv == 0)
    def _():
        m_ref[...] = jnp.full_like(m_ref, -jnp.inf)
        l_ref[...] = jnp.zeros_like(l_ref)
        acc_ref[...] = jnp.zeros_like(acc_ref)

    q = q_ref[...]          # (tq,  H*d_k) bf16, pre-scaled by 1/sqrt(d_k)
    k = k_ref[...]          # (tkv, H*d_k) bf16
    v = v_ref[...]          # (tkv, H*d_k) bf16

    for h in range(n_heads):                          # static unroll over heads
        lo = h * d_k
        q_h = q[:, lo:lo + d_k]                       # (tq,  d_k)
        k_h = k[:, lo:lo + d_k]                       # (tkv, d_k)
        v_h = v[:, lo:lo + d_k]                       # (tkv, d_k)

        # q_h @ k_h^T via contraction on the shared minor dim (no transpose).
        s = jax.lax.dot_general(
            q_h, k_h, (((1,), (1,)), ((), ())),
            preferred_element_type=jnp.float32)       # (tq, tkv) f32

        m_prev = m_ref[h]                             # (tq, 1) f32
        m_new = jnp.maximum(m_prev, jnp.max(s, axis=-1, keepdims=True))
        alpha = jnp.exp(m_prev - m_new)               # f32 rescale factor
        # bf16 exponent: EUP throughput on v6e/v7x; stats/acc stay f32.
        p = jnp.exp((s - m_new).astype(jnp.bfloat16))         # (tq, tkv) bf16
        l_ref[h] = alpha * l_ref[h] + jnp.sum(
            p.astype(jnp.float32), axis=-1, keepdims=True)
        acc_ref[h] = alpha * acc_ref[h] + jnp.dot(
            p, v_h, preferred_element_type=jnp.float32)       # (tq, d_k) f32
        m_ref[h] = m_new

    @pl.when(kv == pl.num_programs(2) - 1)
    def _():
        # Normalize per-head (tq, d_k) accumulators and emit ONE lane-dense
        # (tq, H*d_k) store directly into the (B, S, d_model) output.
        ctx = [acc_ref[h] * pl.reciprocal(l_ref[h], approx=True)
               for h in range(n_heads)]
        o_ref[...] = jnp.concatenate(ctx, axis=-1).astype(o_ref.dtype)


def pallas_attention(q4, k4, v4, slots, n_heads, tq=256, tkv=512,
                     out_dtype=jnp.bfloat16):
    """q4: (Gq, B, Sq, D), k4/v4: (Gk, B, Skv, D) bf16 -> (B, Sq, D).

    `slots` selects which leading-dim slice of each operand holds q/k/v; for
    self-attention the same fused (3, B, S, D) buffer is passed three times.
    """
    _, B, Sq, D = q4.shape
    _, _, Skv, _ = k4.shape
    d_k = D // n_heads
    tq = _pick_tile(Sq, tq, 16)       # sublane dim of bf16 q (16-row packing)
    tkv = _pick_tile(Skv, tkv, 128)   # lane dim of the score tile
    grid = (B, Sq // tq, Skv // tkv)
    qs, ks, vs = slots

    q_spec = pl.BlockSpec((None, None, tq, D), lambda b, qi, ki: (qs, b, qi, 0))
    k_spec = pl.BlockSpec((None, None, tkv, D), lambda b, qi, ki: (ks, b, ki, 0))
    v_spec = pl.BlockSpec((None, None, tkv, D), lambda b, qi, ki: (vs, b, ki, 0))
    o_spec = pl.BlockSpec((None, tq, D), lambda b, qi, ki: (b, qi, 0))

    nb = q4.dtype.itemsize
    n_q_blocks = Sq // tq
    cost = pl.CostEstimate(
        flops=4 * B * n_heads * Sq * Skv * d_k,
        transcendentals=B * n_heads * Sq * Skv,
        bytes_accessed=(B * Sq * D * nb                       # Q read once
                        + 2 * n_q_blocks * B * Skv * D * nb   # K,V per Q block
                        + B * Sq * D * jnp.dtype(out_dtype).itemsize))

    kernel = functools.partial(_mha_flash_kernel, n_heads=n_heads, d_k=d_k)
    return pl.pallas_call(
        kernel,
        out_shape=jax.ShapeDtypeStruct((B, Sq, D), out_dtype),
        grid_spec=pltpu.PrefetchScalarGridSpec(
            num_scalar_prefetch=0,
            grid=grid,
            in_specs=[q_spec, k_spec, v_spec],
            out_specs=o_spec,
            scratch_shapes=[
                pltpu.VMEM((n_heads, tq, 1), jnp.float32),    # running max m
                pltpu.VMEM((n_heads, tq, 1), jnp.float32),    # running sum l
                pltpu.VMEM((n_heads, tq, d_k), jnp.float32),  # output acc
            ]),
        compiler_params=pltpu.CompilerParams(
            dimension_semantics=("parallel", "parallel", "arbitrary"),
            vmem_limit_bytes=_VMEM_LIMIT),
        cost_estimate=cost,
    )(q4, k4, v4)


# ----------------------------------------------------------------------------
# Module wrapper (parameter bookkeeping, no HBM transposes)
# ----------------------------------------------------------------------------
def init_mha_params(key, d_model):
    """Deterministic init mimicking nn.Linear default U(-1/sqrt(in), 1/sqrt(in))."""
    bound = 1.0 / math.sqrt(d_model)
    keys = jax.random.split(key, 8)
    params = {}
    for i, name in enumerate(["q", "k", "v", "o"]):
        params[f"W_{name}"] = jax.random.uniform(
            keys[2 * i], (d_model, d_model), jnp.float32, -bound, bound)
        params[f"b_{name}"] = jax.random.uniform(
            keys[2 * i + 1], (d_model,), jnp.float32, -bound, bound)
    return params


def multi_head_attention(params, Q, K, V, n_heads, mask=None):
    if mask is not None:
        # TODO(synk): attention mask (mask==0 -> -1e9) is not wired into the
        # flash kernel; handle fully-masked rows (all -inf) when adding it.
        raise NotImplementedError("attention mask is not supported")

    B, Sq, d_model = Q.shape
    _, Skv, _ = K.shape
    d_k = d_model // n_heads
    scale = 1.0 / math.sqrt(d_k)
    bf16 = jnp.bfloat16

    if (Q is K) and (K is V):
        # Self-attention: one fused projection with stacked bf16 weights.  The
        # (3, B*S, d_model) output is consumed by the attention kernel via
        # leading-dim BlockSpec indices -> no qkv slicing pass over HBM.
        w_qkv = jnp.stack([params["W_q"] * scale,
                           params["W_k"], params["W_v"]]).astype(bf16)
        b_qkv = jnp.stack([params["b_q"] * scale,
                           params["b_k"], params["b_v"]])[:, None, :]
        qkv = pallas_linear(Q.reshape(B * Sq, d_model).astype(bf16),
                            w_qkv, b_qkv, out_dtype=bf16)
        qkv = qkv.reshape(3, B, Sq, d_model)       # free reshape
        q4 = k4 = v4 = qkv
        slots = (0, 1, 2)
    else:
        def proj(x, w, b, s):
            y = pallas_linear(x.reshape(-1, d_model).astype(bf16),
                              w.astype(bf16)[None],
                              b.reshape(1, 1, d_model), out_dtype=bf16)
            return y.reshape(1, B, s, d_model)     # free reshape
        q4 = proj(Q, params["W_q"] * scale, params["b_q"] * scale, Sq)
        k4 = proj(K, params["W_k"], params["b_k"], Skv)
        v4 = proj(V, params["W_v"], params["b_v"], Skv)
        slots = (0, 0, 0)

    # Attention reads lane-dense (t, d_model) tiles and writes the context
    # directly in (B, Sq, d_model): no head split/combine HBM round-trips.
    ctx = pallas_attention(q4, k4, v4, slots, n_heads)

    out = pallas_linear(ctx.reshape(B * Sq, d_model),
                        params["W_o"].astype(bf16)[None],
                        params["b_o"].reshape(1, 1, d_model),
                        out_dtype=jnp.float32)
    return out.reshape(B, Sq, d_model)


# ----------------------------------------------------------------------------
# Pure-JAX f32 reference for sanity checking
# ----------------------------------------------------------------------------
def reference_mha(params, Q, K, V, n_heads):
    B, Sq, d_model = Q.shape
    _, Skv, _ = K.shape
    d_k = d_model // n_heads

    def lin(x, w, b):
        return x @ w + b

    def split(x, s):
        return x.reshape(B, s, n_heads, d_k).transpose(0, 2, 1, 3)

    q = split(lin(Q, params["W_q"], params["b_q"]), Sq)
    k = split(lin(K, params["W_k"], params["b_k"]), Skv)
    v = split(lin(V, params["W_v"], params["b_v"]), Skv)
    s = jnp.einsum("bhqd,bhkd->bhqk", q, k) / math.sqrt(d_k)
    p = jax.nn.softmax(s, axis=-1)
    a = jnp.einsum("bhqk,bhkd->bhqd", p, v)
    a = a.transpose(0, 2, 1, 3).reshape(B, Sq, d_model)
    return lin(a, params["W_o"], params["b_o"])


if __name__ == "__main__":
    B, S, d_model, n_heads = 2, 8, 32, 4

    key = jax.random.PRNGKey(0)
    kp, kx, kk, kv = jax.random.split(key, 4)
    params = init_mha_params(kp, d_model)
    X = jax.random.normal(kx, (B, S, d_model), jnp.float32)
    K_in = jax.random.normal(kk, (B, S, d_model), jnp.float32)
    V_in = jax.random.normal(kv, (B, S, d_model), jnp.float32)

    # Kernels feed the MXU bf16 inputs (f32 accumulation / f32 softmax stats),
    # so compare to the f32 reference with a tolerance covering bf16 rounding.
    tol = dict(atol=5e-2, rtol=5e-2)

    # Self-attention (fused stacked-QKV projection path).
    out_self = jax.block_until_ready(
        multi_head_attention(params, X, X, X, n_heads))
    assert out_self.shape == (B, S, d_model)
    assert jnp.allclose(out_self, reference_mha(params, X, X, X, n_heads), **tol)

    # Cross-attention (separate projection path).
    out_cross = jax.block_until_ready(
        multi_head_attention(params, X, K_in, V_in, n_heads))
    assert jnp.allclose(
        out_cross, reference_mha(params, X, K_in, V_in, n_heads), **tol)

    print("KERNEL_OK")
</pallas_src>

<mosaic_0001>
module attributes {stable_mosaic.version = 11 : i64} {
  func.func @_linear_kernel(%arg0: i32, %arg1: i32, %arg2: i32, %arg3: i32, %arg4: memref<16x32xbf16, #tpu.memory_space<vmem>>, %arg5: memref<1x32x32xbf16, #tpu.memory_space<vmem>>, %arg6: memref<1x1x32xf32, #tpu.memory_space<vmem>>, %arg7: memref<1x16x32xbf16, #tpu.memory_space<vmem>>, %arg8: memref<16x32xf32, #tpu.memory_space<vmem>>) attributes {dimension_semantics = [#tpu.dimension_semantics<parallel>, #tpu.dimension_semantics<parallel>, #tpu.dimension_semantics<parallel>, #tpu.dimension_semantics<arbitrary>], iteration_bounds = array<i64: 3, 1, 1, 1>, scalar_prefetch = 0 : i64, scratch_operands = 1 : i64, tpu.core_type = #tpu.core_type<tc>, window_params = [{transform_indices = @transform_0, window_bounds = array<i64: 16, 32>}, {transform_indices = @transform_1, window_bounds = array<i64: 1, 32, 32>}, {transform_indices = @transform_2, window_bounds = array<i64: 1, 1, 32>}, {transform_indices = @transform_3, window_bounds = array<i64: 1, 16, 32>}]} {
    %c0_i32 = arith.constant 0 : i32
    %0 = arith.cmpi eq, %arg3, %c0_i32 : i32
    %1 = arith.extui %0 : i1 to i32
    %c0_i32_0 = arith.constant 0 : i32
    %2 = arith.cmpi ne, %1, %c0_i32_0 : i32
    scf.if %2 {
      %cst_11 = arith.constant 0.000000e+00 : f32
      %13 = vector.broadcast %cst_11 : f32 to vector<16x32xf32>
      %c0_12 = arith.constant 0 : index
      %c0_13 = arith.constant 0 : index
      %14 = vector.load %arg8[%c0_12, %c0_13] : memref<16x32xf32, #tpu.memory_space<vmem>>, vector<16x32xf32>
      tpu.vector_store %arg8[%c0_12, %c0_13], %13 {strides = array<i32>} : memref<16x32xf32, #tpu.memory_space<vmem>>, vector<16x32xf32>,
    } else {
    }
    %c0 = arith.constant 0 : index
    %c0_1 = arith.constant 0 : index
    %3 = vector.load %arg8[%c0, %c0_1] : memref<16x32xf32, #tpu.memory_space<vmem>>, vector<16x32xf32>
    %c0_2 = arith.constant 0 : index
    %c0_3 = arith.constant 0 : index
    %4 = vector.load %arg4[%c0_2, %c0_3] : memref<16x32xbf16, #tpu.memory_space<vmem>>, vector<16x32xbf16>
    %c0_4 = arith.constant 0 : index
    %c0_5 = arith.constant 0 : index
    %c0_6 = arith.constant 0 : index
    %5 = vector.load %arg5[%c0_4, %c0_5, %c0_6] : memref<1x32x32xbf16, #tpu.memory_space<vmem>>, vector<1x32x32xbf16>
    %6 = vector.shape_cast %5 : vector<1x32x32xbf16> to vector<32x32xbf16>
    %cst = arith.constant dense<0.000000e+00> : vector<16x32xf32>
    %7 = tpu.matmul %4, %6, %cst {dimension_numbers = #tpu.dot_dimension_numbers<[1], [0], [0], [1], [0, 0, 1, 1], [], []>} : vector<16x32xbf16>, vector<32x32xbf16>, vector<16x32xf32> -> vector<16x32xf32>
    %8 = arith.addf %3, %7 : vector<16x32xf32>
    %c0_7 = arith.constant 0 : index
    %c0_8 = arith.constant 0 : index
    %9 = vector.load %arg8[%c0_7, %c0_8] : memref<16x32xf32, #tpu.memory_space<vmem>>, vector<16x32xf32>
    tpu.vector_store %arg8[%c0_7, %c0_8], %8 {strides = array<i32>} : memref<16x32xf32, #tpu.memory_space<vmem>>, vector<16x32xf32>,
    %c0_i32_9 = arith.constant 0 : i32
    %10 = arith.cmpi eq, %arg3, %c0_i32_9 : i32
    %11 = arith.extui %10 : i1 to i32
    %c0_i32_10 = arith.constant 0 : i32
    %12 = arith.cmpi ne, %11, %c0_i32_10 : i32
    scf.if %12 {
      %c0_11 = arith.constant 0 : index
      %c0_12 = arith.constant 0 : index
      %13 = vector.load %arg8[%c0_11, %c0_12] : memref<16x32xf32, #tpu.memory_space<vmem>>, vector<16x32xf32>
      %c0_13 = arith.constant 0 : index
      %c0_14 = arith.constant 0 : index
      %c0_15 = arith.constant 0 : index
      %14 = vector.load %arg6[%c0_13, %c0_14, %c0_15] : memref<1x1x32xf32, #tpu.memory_space<vmem>>, vector<1x1x32xf32>
      %15 = vector.shape_cast %14 : vector<1x1x32xf32> to vector<1x32xf32>
      %16 = vector.broadcast %15 : vector<1x32xf32> to vector<16x32xf32>
      %17 = arith.addf %13, %16 : vector<16x32xf32>
      %18 = arith.truncf %17 : vector<16x32xf32> to vector<16x32xbf16>
      %c0_16 = arith.constant 0 : index
      %c0_17 = arith.constant 0 : index
      %c0_18 = arith.constant 0 : index
      %19 = vector.load %arg7[%c0_16, %c0_17, %c0_18] : memref<1x16x32xbf16, #tpu.memory_space<vmem>>, vector<1x16x32xbf16>
      %20 = vector.shape_cast %19 : vector<1x16x32xbf16> to vector<16x32xbf16>
      %21 = vector.shape_cast %18 : vector<16x32xbf16> to vector<1x16x32xbf16>
      tpu.vector_store %arg7[%c0_16, %c0_17, %c0_18], %21 {strides = array<i32>} : memref<1x16x32xbf16, #tpu.memory_space<vmem>>, vector<1x16x32xbf16>,
    } else {
    }
    return
  }
  func.func @transform_0(%arg0: i32, %arg1: i32, %arg2: i32, %arg3: i32) -> (i32, i32) {
    %c0_i32 = arith.constant 0 : i32
    return %arg1, %arg3 : i32, i32
  }
  func.func @transform_1(%arg0: i32, %arg1: i32, %arg2: i32, %arg3: i32) -> (i32, i32, i32) {
    %c0_i32 = arith.constant 0 : i32
    return %arg0, %arg3, %arg2 : i32, i32, i32
  }
  func.func @transform_2(%arg0: i32, %arg1: i32, %arg2: i32, %arg3: i32) -> (i32, i32, i32) {
    %c0_i32 = arith.constant 0 : i32
    %c0_i32_0 = arith.constant 0 : i32
    return %arg0, %c0_i32, %arg2 : i32, i32, i32
  }
  func.func @transform_3(%arg0: i32, %arg1: i32, %arg2: i32, %arg3: i32) -> (i32, i32, i32) {
    %c0_i32 = arith.constant 0 : i32
    return %arg0, %arg1, %arg2 : i32, i32, i32
  }
}

</mosaic_0001>

<bundles_post_ra>
// kernel: tpu_custom_call.1
= control target key start
LH: loop header
LB: loop body
LE: loop exit
PB: predicated region body
PF: predicated region fallthrough
CT: control target
= control target key end

     0   :  { %8 = vsyncpa [#allocation4], 0  ;;  %s1016_s0 = inlined_call_operand.hbm [shape: bf16[16,32], index: 0, kind: input, shape index: {}]   ;;  %s1017_s1 = inlined_call_operand.hbm [shape: bf16[3,32,32], index: 1, kind: input, shape index: {}]   ;;  %s1018_s2 = inlined_call_operand.hbm [shape: f32[3,1,32], index: 2, kind: input, shape index: {}]   ;;  %s1019_s3 = inlined_call_operand.hbm [shape: bf16[3,16,32], index: 3, kind: output, shape index: {}]  }
   0x1   :  { %9 = vsyncpa [#allocation7], 0 }
   0x2   :  { %11 = vsyncpa [#allocation7 + $0x1], 0 }
   0x3   :  { %12 = vsyncpa [#allocation5], 0 }
   0x4   :  { %14 = vsyncpa [#allocation5 + $0x1], 0  ;;  %s835_s12 = smov 0   ;;  %s837_s13 = smov 0  }
   0x5   :  { %s839_s14 = smov 0   ;;  %s841_s15 = smov 0  }
   0x6   :  { %s843_s16 = smov 0   ;;  %s845_s17 = smov 0  }
   0x7 LB: > { %s46_s18 = sadd.s32 1, %s803_s16  ;;  %s85_s19 = sadd.s32 1, %s795_s14  ;;  %s807_s17 = sphi %s845_s17, %s20_s17   ;;  %s803_s16 = sphi %s843_s16, %s1030_s16   ;;  %s799_s15 = sphi %s841_s15, %s1029_s15   ;;  %s795_s14 = sphi %s839_s14, %s1028_s14   ;;  %s791_s13 = sphi %s837_s13, %s1027_s13   ;;  %s787_s12 = sphi %s835_s12, %s1026_s12  }
   0x8   : > { %p48_p0 = scmp.ge.s32.totalorder %s46_s18, 3  ;;  %p92_p1 = scmp.ne.s32.totalorder %s795_s14, %s791_s13 }
   0x9   : > { %p93_p2 = scmp.eq.s32.totalorder %s807_s17, 0  ;;  %p573_p5 = scmp.lt.s32.totalorder %s807_s17, 3 }
   0xa   : > { %s1032_s18 = smov (%p48_p0, %s46_s18), 0  ;;  %s198_s22 = sand.u32 1, %s807_s17  }
   0xb   : > { %p875_p3 = por %p93_p2, %p92_p1  ;;  %s78_s21 = ssub.s32 %s803_s16, %s1032_s18 }
   0xc   : > { %p83_p4 = scmp.eq.s32.totalorder %s78_s21, 0  ;;  %s200_s23 = sand.u32 1, %s795_s14  }
   0xd   : > { %s517_s25 = sshll.u32 %s200_s23, 4  ;;  %s542_s26 = sshll.u32 %s803_s16, 4 }
   0xe   : > { %s885_s24 = scalar_select %p83_p4, %s795_s14, %s85_s19  }
   0xf   : > { %s210_s29 = scalar_lea.hbm %s1017_s1, %s542_s26  ;;  %s202_s30 = scalar_lea.vmem [#allocation6], %s517_s25 }
  0x10   : > { %s213_s4 = sshll.u32 %s202_s30, 4  ;;  %s211_s5 = sshll.u32 %s210_s29, 4  ;;  %s214_s4 = int_to_ptr.vmem [resolvable:$true] %s213_s4  ;;  %s212_s5 = int_to_ptr.hbm [resolvable:$true] %s211_s5 }
  0x11   : > { %p895_p6 = pnand %p573_p5, %p875_p3  ;;  %s899_s7 = scalar_lea.sflag [#allocation7], %s198_s22 }
  0x12   : > { %s809_s8 = smov 64   ;;  %s810_s9 = smov 4  }
  0x13   : > { %564 = dma.hbm_to_vmem [thread:$0]  (!%p895_p6), %s212_s5, 256, %s214_s4, %s899_s7, %s809_s8, %s809_s8, %s810_s9  }
  0x14   : > { %s908_s10 = sadd.s32 4294967295, %s807_s17   ;;  %s513_s11 = sadd.s32 4294967294, %s807_s17  }
  0x15   : > { %p98_p7 = scmp.ne.s32.totalorder %s791_s13, %s787_s12  ;;  %p99_p8 = scmp.eq.s32.totalorder %s908_s10, 0 }
  0x16   : > { %p154_p9 = scmp.eq.s32.totalorder %s908_s10, 2  ;;  %p160_p10 = scmp.eq.s32.totalorder %s513_s11, 2 }
  0x17   : > { %p514_p11 = scmp.ge.s32.totalorder %s807_s17, 1  ;;  %p918_p12 = por %p99_p8, %p98_p7 }
  0x18   : > { %p925_p13 = por %p154_p9, %p92_p1  ;;  %p929_p0 = por %p160_p10, %p98_p7 }
  0x19   : > { %p167_p2 = scmp.lt.s32.totalorder %s807_s17, 4  ;;  %s182_s26 = sshll.u32 %s1016_s0, 4  ;;  %s183_s26 = int_to_ptr.hbm [resolvable:$true] %s182_s26 }
  0x1a   : > { %s811_s28 = smov [#allocation3]   ;;  %s230_s5 = scalar_lea.hbm %s1018_s2, %s803_s16 }
  0x1b   : > { %p937_p3 = pnand %p514_p11, %p167_p2  ;;  %s184_s29 = sshll.u32 %s811_s28, 4  ;;  %s185_s29 = int_to_ptr.vmem [resolvable:$true] %s184_s29 }
  0x1c   : > { %s232_s11 = sshll.u32 %s230_s5, 4  ;;  %s226_s22 = scalar_lea.vmem [#allocation8], %s200_s23  ;;  %s233_s11 = int_to_ptr.hbm [resolvable:$true] %s232_s11 }
  0x1d   : > { %p557_p1 = pneg %p937_p3  ;;  %s234_s25 = sshll.u32 %s226_s22, 4  ;;  %s235_s25 = int_to_ptr.vmem [resolvable:$true] %s234_s25 }
  0x1e   : > { %567 = dma.hbm_to_vmem [thread:$0]  (!%p895_p6), %s233_s11, 16, %s235_s25, %s899_s7  }
  0x1f   : > { %p558_p4 = pnand %p557_p1, %p99_p8  ;;  %243 = sbr.rel (%p937_p3) target bundleno = 201 (0xc9), region = 32 }
  0x21   : > { %560 = dma.hbm_to_vmem [thread:$0]  (!%p558_p4), %s183_s26, 128, %s185_s29, [#allocation4], %s809_s8, %s809_s8, %s810_s9  }
  0x24   : > { %774 = dma.done.wait (%p99_p8), [#allocation4], 128  }
  0x25   : > { %776 = vsyncadd (%p99_p8), [#allocation4], 4294967168  ;;  %s250_s23 = sand.u32 1, %s908_s10   ;;  %s965_s28 = sand.u32 1, %s791_s13  }
  0x26   : > { %s522_s30 = sshll.u32 %s965_s28, 4  ;;  %s251_s8 = scalar_lea.sflag [#allocation7], %s250_s23 }
  0x27   : > { %s254_s6 = scalar_lea.vmem [#allocation6], %s522_s30 }
  0x28   : > { %778 = dma.done.wait (%p918_p12), %s251_s8, 272  }
  0x29   : > { %780 = vsyncadd (%p918_p12), %s251_s8, 4294967024  ;;  %vm299_vm0 = vcmask 261120   ;;  %v812_v0 = vmov 0.0   ;;  %v545_v1 = vld [vmem:[%s254_s6 + $0x8] sm:$0xff]  ;;  %v544_v2 = vld [vmem:[%s254_s6] sm:$0xff]  ;;  %s263_s7 = scalar_lea.vmem [#allocation8], %s965_s28 }
  0x2a   : > { %300 = vst.msk [vmem:[#allocation2] sm:$0xff] %vm299_vm0, %v812_v0  ;;  %337 = vmatpush.bf16.msra.mxu0 %v545_v1  ;;  %v543_v3 = vld [vmem:[#allocation3] sm:$0xff]  ;;  %v630_v8 = vld [vmem:[%s263_s7] ss:$0 sm:$0xff]  ;;  %s523_s9 = sshll.u32 %s965_s28, 3  ;;  %s546_s10 = sshll.u32 %s799_s15, 3 }
  0x2b   : > { %301 = vst.msk [vmem:[#allocation2 + $0x8] sm:$0xff] %vm299_vm0, %v812_v0  ;;  %vm362_vm1 = vcmask 257024   ;;  %s380_s27 = scalar_lea.hbm %s1019_s3, %s546_s10  ;;  %s290_s29 = scalar_lea.vmem [#allocation9], %s523_s9 }
  0x2c   : > { %s381_s4 = sshll.u32 %s290_s29, 4  ;;  %s383_s5 = sshll.u32 %s380_s27, 4  ;;  %s382_s4 = int_to_ptr.vmem [resolvable:$true] %s381_s4  ;;  %s384_s5 = int_to_ptr.hbm [resolvable:$true] %s383_s5 }
  0x2d   : > { %s366_s11 = scalar_lea.sflag [#allocation5], %s965_s28  ;;  %s735_s22 = sshra.s32 %s384_s5, 4  ;;  %s736_s22 = int_to_ptr.hbm [resolvable:$true] %s735_s22 }
  0x2e   : > { %338 = vmatpush.bf16.msra.mxu0 %v544_v2  ;;  %s737_s15 = scalar_lea.hbm %s736_s22, 8  ;;  %s741_s30 = scalar_lea.hbm %s1019_s3, 24 }
  0x2f   : > { %p738_p5 = scmp.ne.s32.totalorder %s736_s22, %s737_s15  ;;  %p742_p8 = scmp.lt.s32.totalorder %s736_s22, %s1019_s3 }
  0x30   : > { %p743_p9 = scmp.lt.s32.totalorder %s741_s30, %s737_s15 }
  0x31   : > { %536 = vmatmul.msk.bf16.vlgmr.msra.gmra.mxu0 %vm299_vm0, %v543_v3  ;;  %v302_v4 = vld [vmem:[#allocation2] sm:$0xff]  ;;  %p739_p6 = pnand %p738_p5, %p925_p13 }
  0x32   : > { %v303_v7 = vld [vmem:[#allocation2 + $0x8] sm:$0xff]  ;;  %p744_p10 = por %p743_p9, %p742_p8 }
  0x33   : > { %p740_p7 = pneg %p739_p6 }
  0x35   : > { %p745_p11 = pnand %p744_p10, %p740_p7 }
  0xae   : > { %v340_v5 = vpop.f32.mrf.mxu0 }
  0xaf   : > { %v345_v6 = vadd.f32 %v340_v5, %v302_v4 }
  0xb1   : > { %347 = vst.msk [vmem:[#allocation2] sm:$0xff] %vm299_vm0, %v345_v6 }
  0xb6   : > { %v342_v9 = vpop.f32.mrf.mxu0 }
  0xb7   : > { %v346_v10 = vadd.f32 %v342_v9, %v303_v7 }
  0xb8   : > { %v352_v11 = vld [vmem:[#allocation2] sm:$0xff] }
  0xb9   : > { %348 = vst.msk [vmem:[#allocation2 + $0x8] sm:$0xff] %vm299_vm0, %v346_v10  ;;  %v358_v12 = vadd.f32 %v630_v8, %v352_v11 }
  0xbb   : > { %v360_v13 = vpack.c.bf16 %v358_v12, %v358_v12 }
  0xbd   : > { %363 = vst.msk [vmem:[%s290_s29] sm:$0xf] %vm362_vm1, %v360_v13 }
  0xc0   : > { %v353_v14 = vld [vmem:[#allocation2 + $0x8] sm:$0xff] }
  0xc1   : > { %v359_v15 = vadd.f32 %v630_v8, %v353_v14 }
  0xc3   : > { %v361_v16 = vpack.c.bf16 %v359_v15, %v359_v15 }
  0xc5   : > { %364 = vst.msk [vmem:[%s290_s29 + $0x4] sm:$0xf] %vm362_vm1, %v361_v16 }
  0xc6   : > { %748 = shalt.err (!%p745_p11)
}
  0xc7   : > { %s813_s28 = smov 64   ;;  %s814_s7 = smov 4  }
  0xc8   : > { %555 = dma.vmem_to_hbm [thread:$0]  (%p925_p13), %s382_s4, 128, %s384_s5, %s366_s11, %s813_s28, %s813_s28, %s814_s7  }
  0xc9 PF: > { %p575_p12 = scmp.ge.s32.totalorder %s807_s17, 2  ;;  %s398_s9 = sand.u32 1, %s787_s12  }
  0xca   : > { %s399_s10 = scalar_lea.sflag [#allocation5], %s398_s9 }
  0xcb   : > { %p569_p2 = pnand %p575_p12, %p929_p0 }
  0xcd   : > { %p570_p3 = pneg %p569_p2 }
  0xcf   : > { %782 = dma.done.wait (%p570_p3), %s399_s10, 128  }
  0xd0   : > { %784 = vsyncadd (%p570_p3), %s399_s10, 4294967168  ;;  %s20_s17 = sadd.s32 1, %s807_s17   ;;  %s1026_s12 = smov %s791_s13 }
  0xd1   : > { %p17_p1 = scmp.ge.s32.totalorder %s20_s17, 5   ;;  %s1027_s13 = smov %s795_s14 }
  0xd2   : > { %s1028_s14 = smov %s885_s24  ;;  %s1029_s15 = smov %s803_s16 }
  0xd3   : > { %s1030_s16 = smov %s1032_s18  ;;  %19 = sbr.rel (!%p17_p1) target bundleno = 7 (0x7), region = 102 }
  0xd8   :  { %405 = vsyncpa [#allocation4], 1 }
  0xd9   :  { %407 = vsyncpa [#allocation4 + $0x1], 1 }
  0xda   :  { %408 = vsyncpa [#allocation7], 1 }
  0xdb   :  { %410 = vsyncpa [#allocation7 + $0x1], 1 }
  0xdc   :  { %411 = vsyncpa [#allocation5], 1 }
  0xdd   :  { %413 = vsyncpa [#allocation5 + $0x1], 1 }

</bundles_post_ra>
